<compile_context>
chip_gen: v7x
topology: tpu7x:2x2x1
jax: 0.10.0
libtpu: 0.0.40
codegen_flags: <defaults>
</compile_context>

<pallas_src>
import functools

import jax
import jax.numpy as jnp
from jax.experimental import pallas as pl
from jax.experimental.pallas import tpu as pltpu


def _causal_conv1d_kernel(*refs, kernel_size, dilation, pad, halo_w, has_halo):
    # Ref layout (in_specs order, then output):
    #   has_halo:  x_ref, halo_ref, w_ref, b_ref, o_ref
    #   else:      x_ref,           w_ref, b_ref, o_ref
    if has_halo:
        x_ref, halo_ref, w_ref, b_ref, o_ref = refs
    else:
        x_ref, w_ref, b_ref, o_ref = refs
        halo_ref = None

    tile_t = o_ref.shape[2]
    cur = x_ref[0]                                    # (C_in, tile_t)

    if pad > 0:
        if has_halo:
            # Halo = tail of the previous time tile, re-read from HBM (no
            # sequential carry -> time axis can be "parallel").  At t==0 the
            # clamped block points at real data, so mask it to zeros (causal pad).
            t_idx = pl.program_id(1)
            halo = halo_ref[0]                        # (C_in, halo_w)
            halo = jnp.where(t_idx > 0, halo, jnp.zeros_like(halo))
            # halo_w is a multiple of 128 -> `cur` lands lane-aligned in the window.
            window = jnp.concatenate([halo, cur], axis=-1)   # (C_in, halo_w+tile_t)
            start0 = halo_w - pad
        else:
            # Single time tile: causal left pad with zeros (tiny, T is small/ragged here).
            zeros = jnp.zeros((cur.shape[0], pad), dtype=cur.dtype)
            window = jnp.concatenate([zeros, cur], axis=-1)  # (C_in, pad+tile_t)
            start0 = 0
    else:
        window = cur
        start0 = 0

    # K is small & static: unrolled loop, one small MXU matmul per dilated tap,
    # accumulated in registers (f32).  Single aligned store at the end.
    acc = None
    for k in range(kernel_size):
        off = start0 + k * dilation
        contrib = jnp.dot(w_ref[k], window[:, off:off + tile_t],
                          preferred_element_type=jnp.float32)
        acc = contrib if acc is None else acc + contrib
    acc = acc + b_ref[...].astype(jnp.float32)        # (C_out, 1) broadcast
    o_ref[0] = acc.astype(o_ref.dtype)


def causal_conv1d(x_nct, weight, bias, dilation, tile_t=None):
    """x_nct: (B, C_in, T); weight: (C_out, C_in, K); bias: (C_out,) -> (B, C_out, T)."""
    B, C_in, T = x_nct.shape
    C_out, _, K = weight.shape
    pad = (K - 1) * dilation
    # Halo block width rounded up to a lane tile (128) so the halo BlockSpec and
    # the in-kernel window stay lane-aligned.
    halo_w = (-(-pad // 128)) * 128 if pad > 0 else 0

    # Time tile: largest 128-multiple divisor of T, capped at 2048 (per review;
    # double-buffered blocks stay in the low-MiB range on every generation).
    if tile_t is None:
        tile_t = T
        if T % 128 == 0:
            for cand in (2048, 1024, 512, 256, 128):
                if T % cand == 0 and (pad == 0 or
                                      (cand >= halo_w and cand % halo_w == 0)):
                    tile_t = cand
                    break
        # else: ragged T -> single full-T tile (masked stores); pad T to a 128
        # multiple producer-side for real sequence lengths.
    else:
        assert T % tile_t == 0, "tile_t must divide T"
        assert tile_t == T or tile_t % 128 == 0, "tile_t must be a multiple of 128 (or T)"
    num_t = T // tile_t
    has_halo = pad > 0 and num_t > 1
    if has_halo:
        assert tile_t >= halo_w and tile_t % halo_w == 0, (
            "time tile must cover (and be a multiple of) the 128-rounded halo")

    # Tiny one-time weight/bias reshapes (no full-tensor HBM passes).  Weights are
    # cast to x's dtype so bf16 producers get bf16 MXU inputs; accumulation is f32.
    w_taps = jnp.transpose(weight, (2, 0, 1)).astype(x_nct.dtype)   # (K, C_out, C_in)
    b_col = bias.reshape(C_out, 1).astype(jnp.float32)

    kernel = functools.partial(
        _causal_conv1d_kernel,
        kernel_size=K, dilation=dilation, pad=pad, halo_w=halo_w, has_halo=has_halo)

    in_specs = [pl.BlockSpec((1, C_in, tile_t), lambda b, t: (b, 0, t))]
    args = [x_nct]
    if has_halo:
        r = tile_t // halo_w
        # Tail of the previous time tile: block index (t*r - 1) along a halo_w grid,
        # clamped to 0 at t==0 (masked to zeros inside the kernel).
        in_specs.append(
            pl.BlockSpec((1, C_in, halo_w),
                         lambda b, t, r=r: (b, 0, jnp.maximum(t * r - 1, 0))))
        args.append(x_nct)
    in_specs += [
        # constant index -> weights/bias fetched once, not re-streamed per step
        pl.BlockSpec((K, C_out, C_in), lambda b, t: (0, 0, 0)),
        pl.BlockSpec((C_out, 1), lambda b, t: (0, 0)),
    ]
    args += [w_taps, b_col]

    # Explicit VMEM budget: double-buffered in/out blocks + weights, with headroom;
    # clamp to [16 MiB, 64 MiB] so it is safe on v5e defaults and v7x's 64 MiB VMEM.
    itemsize = jnp.dtype(x_nct.dtype).itemsize
    est = 2 * (C_in * tile_t * itemsize
               + (C_in * halo_w * itemsize if has_halo else 0)
               + C_out * tile_t * itemsize)
    est += K * C_out * C_in * itemsize + C_out * 4
    vmem_limit = int(min(max(4 * est, 16 * 1024 * 1024), 64 * 1024 * 1024))

    return pl.pallas_call(
        kernel,
        out_shape=jax.ShapeDtypeStruct((B, C_out, T), x_nct.dtype),
        grid_spec=pltpu.PrefetchScalarGridSpec(
            num_scalar_prefetch=0,
            grid=(B, num_t),
            in_specs=in_specs,
            out_specs=pl.BlockSpec((1, C_out, tile_t), lambda b, t: (b, 0, t)),
        ),
        compiler_params=pltpu.CompilerParams(
            # No cross-step state: both axes independent -> megacore-shardable
            # (uses both TensorCores on v7x even at small batch).
            dimension_semantics=("parallel", "parallel"),
            vmem_limit_bytes=vmem_limit,
        ),
    )(*args)


def _reference(x_nct, weight, bias, dilation):
    """Pure-JAX reference of the PyTorch forward."""
    K = weight.shape[-1]
    pad = (K - 1) * dilation
    x_p = jnp.pad(x_nct, ((0, 0), (0, 0), (pad, 0)))
    out = jax.lax.conv_general_dilated(
        x_p, weight,
        window_strides=(1,),
        padding="VALID",
        rhs_dilation=(dilation,),
        dimension_numbers=("NCH", "OIH", "NCH"),
    )
    return out + bias[None, :, None]


if __name__ == "__main__":
    in_channels, out_channels, kernel_size, dilation = 4, 8, 3, 2
    B, T = 2, 16

    key = jax.random.PRNGKey(0)
    kx, kw, kb, kx2 = jax.random.split(key, 4)
    x = jax.random.normal(kx, (B, in_channels, T), dtype=jnp.float32)
    weight = jax.random.normal(kw, (out_channels, in_channels, kernel_size),
                               dtype=jnp.float32) * 0.1
    bias = jax.random.normal(kb, (out_channels,), dtype=jnp.float32) * 0.1

    # 1) small single-time-tile case (matches the module's tiny config)
    out = jax.block_until_ready(causal_conv1d(x, weight, bias, dilation))
    ref = _reference(x, weight, bias, dilation)
    assert out.shape == (B, out_channels, T)
    assert jnp.allclose(out, ref, atol=1e-5, rtol=1e-5)

    # 2) exercise the T-tiled, fully-parallel halo-re-read path, still small.
    T2, dilation2 = 256, 4
    x2 = jax.random.normal(kx2, (B, in_channels, T2), dtype=jnp.float32)
    out2 = jax.block_until_ready(
        causal_conv1d(x2, weight, bias, dilation2, tile_t=128))
    ref2 = _reference(x2, weight, bias, dilation2)
    assert out2.shape == (B, out_channels, T2)
    assert jnp.allclose(out2, ref2, atol=1e-5, rtol=1e-5)

    print("KERNEL_OK")
</pallas_src>

<mosaic_0001>
module attributes {stable_mosaic.version = 11 : i64} {
  func.func @_causal_conv1d_kernel(%arg0: i32, %arg1: i32, %arg2: memref<1x4x16xf32, #tpu.memory_space<vmem>>, %arg3: memref<3x8x4xf32, #tpu.memory_space<vmem>>, %arg4: memref<8x1xf32, #tpu.memory_space<vmem>>, %arg5: memref<1x8x16xf32, #tpu.memory_space<vmem>>) attributes {dimension_semantics = [#tpu.dimension_semantics<parallel>, #tpu.dimension_semantics<parallel>], iteration_bounds = array<i64: 2, 1>, scalar_prefetch = 0 : i64, scratch_operands = 0 : i64, tpu.core_type = #tpu.core_type<tc>, window_params = [{transform_indices = @transform_0, window_bounds = array<i64: 1, 4, 16>}, {pipeline_mode = #tpu.pipeline_mode<synchronous>, transform_indices = @transform_1, window_bounds = array<i64: 3, 8, 4>}, {pipeline_mode = #tpu.pipeline_mode<synchronous>, transform_indices = @transform_2, window_bounds = array<i64: 8, 1>}, {transform_indices = @transform_3, window_bounds = array<i64: 1, 8, 16>}]} {
    %c0 = arith.constant 0 : index
    %c0_0 = arith.constant 0 : index
    %c0_1 = arith.constant 0 : index
    %0 = vector.load %arg2[%c0, %c0_0, %c0_1] : memref<1x4x16xf32, #tpu.memory_space<vmem>>, vector<1x4x16xf32>
    %1 = vector.shape_cast %0 : vector<1x4x16xf32> to vector<4x16xf32>
    %cst = arith.constant 0.000000e+00 : f32
    %2 = vector.broadcast %cst : f32 to vector<4x4xf32>
    %3 = tpu.concatenate %2, %1 in 1 : vector<4x4xf32>, vector<4x16xf32> -> vector<4x20xf32>
    %c0_2 = arith.constant 0 : index
    %c0_3 = arith.constant 0 : index
    %c0_4 = arith.constant 0 : index
    %4 = vector.load %arg3[%c0_2, %c0_3, %c0_4] : memref<3x8x4xf32, #tpu.memory_space<vmem>>, vector<1x8x4xf32>
    %5 = vector.shape_cast %4 : vector<1x8x4xf32> to vector<8x4xf32>
    %6 = vector.extract_strided_slice %3 {offsets = [0, 0], sizes = [4, 16], strides = [1, 1]} : vector<4x20xf32> to vector<4x16xf32>
    %cst_5 = arith.constant dense<0.000000e+00> : vector<8x16xf32>
    %7 = tpu.matmul %5, %6, %cst_5 {dimension_numbers = #tpu.dot_dimension_numbers<[1], [0], [0], [1], [0, 0, 1, 1], [], []>} : vector<8x4xf32>, vector<4x16xf32>, vector<8x16xf32> -> vector<8x16xf32>
    %c1 = arith.constant 1 : index
    %c0_6 = arith.constant 0 : index
    %c0_7 = arith.constant 0 : index
    %8 = vector.load %arg3[%c1, %c0_6, %c0_7] : memref<3x8x4xf32, #tpu.memory_space<vmem>>, vector<1x8x4xf32>
    %9 = vector.shape_cast %8 : vector<1x8x4xf32> to vector<8x4xf32>
    %10 = vector.extract_strided_slice %3 {offsets = [0, 2], sizes = [4, 16], strides = [1, 1]} : vector<4x20xf32> to vector<4x16xf32>
    %cst_8 = arith.constant dense<0.000000e+00> : vector<8x16xf32>
    %11 = tpu.matmul %9, %10, %cst_8 {dimension_numbers = #tpu.dot_dimension_numbers<[1], [0], [0], [1], [0, 0, 1, 1], [], []>} : vector<8x4xf32>, vector<4x16xf32>, vector<8x16xf32> -> vector<8x16xf32>
    %12 = arith.addf %7, %11 : vector<8x16xf32>
    %c2 = arith.constant 2 : index
    %c0_9 = arith.constant 0 : index
    %c0_10 = arith.constant 0 : index
    %13 = vector.load %arg3[%c2, %c0_9, %c0_10] : memref<3x8x4xf32, #tpu.memory_space<vmem>>, vector<1x8x4xf32>
    %14 = vector.shape_cast %13 : vector<1x8x4xf32> to vector<8x4xf32>
    %15 = vector.extract_strided_slice %3 {offsets = [0, 4], sizes = [4, 16], strides = [1, 1]} : vector<4x20xf32> to vector<4x16xf32>
    %cst_11 = arith.constant dense<0.000000e+00> : vector<8x16xf32>
    %16 = tpu.matmul %14, %15, %cst_11 {dimension_numbers = #tpu.dot_dimension_numbers<[1], [0], [0], [1], [0, 0, 1, 1], [], []>} : vector<8x4xf32>, vector<4x16xf32>, vector<8x16xf32> -> vector<8x16xf32>
    %17 = arith.addf %12, %16 : vector<8x16xf32>
    %c0_12 = arith.constant 0 : index
    %c0_13 = arith.constant 0 : index
    %18 = vector.load %arg4[%c0_12, %c0_13] : memref<8x1xf32, #tpu.memory_space<vmem>>, vector<8x1xf32>
    %19 = vector.broadcast %18 : vector<8x1xf32> to vector<8x16xf32>
    %20 = arith.addf %17, %19 : vector<8x16xf32>
    %c0_14 = arith.constant 0 : index
    %c0_15 = arith.constant 0 : index
    %c0_16 = arith.constant 0 : index
    %21 = vector.load %arg5[%c0_14, %c0_15, %c0_16] : memref<1x8x16xf32, #tpu.memory_space<vmem>>, vector<1x8x16xf32>
    %22 = vector.shape_cast %21 : vector<1x8x16xf32> to vector<8x16xf32>
    %23 = vector.shape_cast %20 : vector<8x16xf32> to vector<1x8x16xf32>
    tpu.vector_store %arg5[%c0_14, %c0_15, %c0_16], %23 {strides = array<i32>} : memref<1x8x16xf32, #tpu.memory_space<vmem>>, vector<1x8x16xf32>,
    return
  }
  func.func @transform_0(%arg0: i32, %arg1: i32) -> (i32, i32, i32) {
    %c0_i32 = arith.constant 0 : i32
    %c0_i32_0 = arith.constant 0 : i32
    return %arg0, %c0_i32, %arg1 : i32, i32, i32
  }
  func.func @transform_1(%arg0: i32, %arg1: i32) -> (i32, i32, i32) {
    %c0_i32 = arith.constant 0 : i32
    %c0_i32_0 = arith.constant 0 : i32
    %c0_i32_1 = arith.constant 0 : i32
    %c0_i32_2 = arith.constant 0 : i32
    return %c0_i32, %c0_i32_0, %c0_i32_1 : i32, i32, i32
  }
  func.func @transform_2(%arg0: i32, %arg1: i32) -> (i32, i32) {
    %c0_i32 = arith.constant 0 : i32
    %c0_i32_0 = arith.constant 0 : i32
    %c0_i32_1 = arith.constant 0 : i32
    return %c0_i32, %c0_i32_0 : i32, i32
  }
  func.func @transform_3(%arg0: i32, %arg1: i32) -> (i32, i32, i32) {
    %c0_i32 = arith.constant 0 : i32
    %c0_i32_0 = arith.constant 0 : i32
    return %arg0, %c0_i32, %arg1 : i32, i32, i32
  }
}

</mosaic_0001>

<bundles_post_ra>
// kernel: tpu_custom_call.1
= control target key start
LH: loop header
LB: loop body
LE: loop exit
PB: predicated region body
PF: predicated region fallthrough
CT: control target
= control target key end

     0   :  { %8 = vsyncpa [#allocation3], 0  ;;  %s874_s0 = inlined_call_operand.vmem [shape: f32[2,4,16], index: 0, kind: input, shape index: {}]   ;;  %s875_s1 = inlined_call_operand.vmem [shape: f32[3,8,4], index: 1, kind: input, shape index: {}]   ;;  %s876_s2 = inlined_call_operand.vmem [shape: f32[8,1], index: 2, kind: input, shape index: {}]   ;;  %s877_s3 = inlined_call_operand.hbm [shape: f32[2,8,16], index: 3, kind: output, shape index: {}]  }
   0x1   :  { %10 = vsyncpa [#allocation3 + $0x1], 0  ;;  %s740_s12 = smov 0   ;;  %s742_s13 = smov 0  }
   0x2   :  { %s744_s14 = smov 0   ;;  %s746_s15 = smov 0  }
   0x3   :  { %s748_s16 = smov 0   ;;  %s750_s17 = smov 0  }
   0x4 LB: > { %s530_s18 = sadd.s32 4294967295, %s711_s17   ;;  %s531_s19 = sadd.s32 4294967294, %s711_s17   ;;  %s711_s17 = sphi %s750_s17, %s16_s17   ;;  %s707_s16 = sphi %s748_s16, %s884_s16   ;;  %s703_s15 = sphi %s746_s15, %s883_s15   ;;  %s699_s14 = sphi %s744_s14, %s882_s14   ;;  %s695_s13 = sphi %s742_s13, %s881_s13   ;;  %s691_s12 = sphi %s740_s12, %s880_s12  }
   0x5   : > { %s28_s20 = sadd.s32 1, %s707_s16  ;;  %s107_s21 = sadd.s32 1, %s699_s14 }
   0x6   : > { %p30_p0 = scmp.ge.s32.totalorder %s28_s20, 2  ;;  %p117_p1 = scmp.ne.s32.totalorder %s699_s14, %s695_s13 }
   0x7   : > { %p118_p2 = scmp.eq.s32.totalorder %s530_s18, 1  ;;  %p123_p3 = scmp.ne.s32.totalorder %s695_s13, %s691_s12 }
   0x8   : > { %s886_s20 = smov (%p30_p0, %s28_s20), 0  ;;  %p124_p5 = scmp.eq.s32.totalorder %s531_s19, 1 }
   0x9   : > { %p780_p4 = por %p118_p2, %p117_p1  ;;  %s102_s23 = ssub.s32 %s707_s16, %s886_s20 }
   0xa   : > { %p534_p6 = scmp.ge.s32.totalorder %s711_s17, 1  ;;  %p105_p7 = scmp.eq.s32.totalorder %s102_s23, 0 }
   0xb   : > { %p787_p8 = por %p124_p5, %p123_p3  ;;  %p158_p9 = scmp.lt.s32.totalorder %s711_s17, 3 }
   0xc   : > { %s793_s25 = scalar_select %p105_p7, %s699_s14, %s107_s21  }
   0xd   : > { %p159_p10 = pnand %p534_p6, %p158_p9 }
   0xe   : > { %p184_p11 = scmp.lt.s32.totalorder (!%p159_p10), %s703_s15, 1  ;;  %v713_v0 = vmov (!%p159_p10), 0.0   ;;  %s714_s4 = smov (!%p159_p10), 4   ;;  %vm715_vm0 = vmmov (!%p159_p10), 0   ;;  %v716_v2 = vmov (!%p159_p10), 0   ;;  %vm196_vm1 = vcmask (!%p159_p10), 31744  }
   0xf   : > { %162 = sbr.rel (%p159_p10) target bundleno = 493 (0x1ed), region = 32  ;;  %560 = vmatprep.subr.mxu1 (!%p159_p10), %v713_v0  ;;  %555 = vmatprep.subr.mxu0 (!%p159_p10), %v713_v0  ;;  %vm207_vm2 = vcmask (!%p159_p10), 1043456   ;;  %v198_v5 = vld [vmem:[%s875_s1] sm:$0xff] (!%p159_p10)  ;;  %s717_s7 = smov (!%p159_p10), 124   ;;  %v537_v7 = vld [vmem:[%s875_s1 + $0x8] sm:$0xff] (!%p159_p10)  ;;  %v542_v10 = vld [vmem:[%s875_s1 + $0x10] sm:$0xff] (!%p159_p10) }
  0x10   : > { %557 = vmatprep.mubr.msk.f32.mxu0 (!%p159_p10), %vm715_vm0, %v713_v0  ;;  %562 = vmatprep.mubr.msk.f32.mxu1 (!%p159_p10), %vm715_vm0, %v713_v0  ;;  %s718_s8 = smov (!%p159_p10), 126   ;;  %v435_v6 = vld [vmem:[%s876_s2] sm:$0xff] (!%p159_p10)  ;;  %s181_s23 = sand.u32 (!%p159_p10), 1, %s695_s13   ;;  %vm442_vm3 = vcmask (!%p159_p10), 130048  }
  0x11   : > { %631 = vset.pattern.permute.xlu1 (!%p159_p10), %v716_v2  ;;  %632 = vset.pattern.permute.xlu0 (!%p159_p10), %v716_v2  ;;  %s445_s6 = scalar_lea.sflag (!%p159_p10), [#allocation3], %s181_s23 }
  0x16   : > { %s185_s26 = scalar_select %p184_p11, %s703_s15, 1 }
  0x18   : > { %s536_s27 = sshll.u32 %s185_s26, 2  ;;  %s535_s26 = sshll.u32 %s181_s23, 3 }
  0x19   : > { %s190_s30 = scalar_lea.vmem %s874_s0, %s536_s27  ;;  %s546_s27 = sshll.u32 %s703_s15, 7 }
  0x1a   : > { %v191_v1 = vld [vmem:[%s190_s30] sm:$0xf]  ;;  %s183_s28 = scalar_lea.vmem [#allocation2], %s535_s26  ;;  %s827_s5 = scalar_lea.hbm %s877_s3, %s546_s27 }
  0x1b   : > { %193 = vrot.lane.b32.xlu0 %v191_v1, %s714_s4  ;;  %s459_s29 = sshll.u32 %s183_s28, 4  ;;  %s719_s15 = smov [#allocation2]   ;;  %s829_s29 = int_to_ptr.vmem [resolvable:$true] %s459_s29 }
  0x8d   : > { %v194_v3 = vpop.permute.xlu0 %193 }
  0x8e   : > { %v197_v4 = vsel %vm196_vm1, 0.0, %v194_v3 }
  0x8f   : > { %357 = vrot.lane.b32.xlu1 %v197_v4, %s717_s7  ;;  %202 = vrot.lane.b32.xlu0 %v197_v4, %s718_s8  ;;  %s633_s7 = scalar_lea.vmem %s829_s29, 128  ;;  %s637_s8 = sshll.u32 %s719_s15, 4  ;;  %s638_s8 = int_to_ptr.vmem [resolvable:$false] %s637_s8 }
  0x90   : > { %561 = vmatpush3.msk.msra.mxu1 %vm207_vm2, %v197_v4  ;;  %p634_p12 = scmp.ne.s32.totalorder %s829_s29, %s633_s7  ;;  %s639_s9 = scalar_lea.vmem %s638_s8, 256 }
  0x91   : > { %563 = vmatmul.mubr.msk.f32.vlgmr.msra.gmra.mrb[0].mxu1 %vm196_vm1, %v198_v5  ;;  %p640_p1 = scmp.lt.s32.totalorder %s829_s29, %s638_s8  ;;  %p641_p2 = scmp.lt.s32.totalorder %s639_s9, %s633_s7 }
  0x92   : > { %p635_p13 = pnand %p634_p12, %p780_p4 }
  0x93   : > { %438 = vperm.xlu1 %631, %v435_v6   ;;  %p642_p3 = por %p641_p2, %p640_p1 }
  0x94   : > { %p636_p0 = pneg %p635_p13 }
  0x96   : > { %p643_p5 = pnand %p642_p3, %p636_p0 }
 0x101   : > { %v203_v8 = vpop.permute.xlu0 %202  ;;  %v358_v9 = vpop.permute.xlu1 %357 }
 0x102   : > { %556 = vmatpush3.msk.msra.mxu0 %vm207_vm2, %v203_v8 }
 0x103   : > { %558 = vmatmul.mubr.msk.f32.vlgmr.msra.gmra.mrb[0].mxu0 %vm196_vm1, %v537_v7  ;;  %565 = vmatprep.subr.mxu0 %v713_v0 }
 0x104   : > { %566 = vmatpush3.msk.msra.mxu0 %vm207_vm2, %v358_v9  ;;  %567 = vmatprep.mubr.msk.f32.mxu0 %vm715_vm0, %v713_v0 }
 0x107   : > { %568 = vmatmul.mubr.msk.f32.vlgmr.msra.gmra.mrb[2].mxu0 %vm196_vm1, %v542_v10 }
 0x112   : > { %v439_v17 = vpop.permute.xlu1 %438 }
 0x164   : > { %v351_v11 = vpop.f32.mrb[0].mxu1 }
 0x165   : > { %v564_v12 = vpop.f32.mrb[1].mxu1 }
 0x1d6   : > { %v276_v13 = vpop.f32.mrb[0].mxu0 }
 0x1d7   : > { %v559_v14 = vpop.f32.mrb[1].mxu0  ;;  %v352_v15 = vadd.f32 %v351_v11, %v276_v13 }
 0x1da   : > { %v430_v16 = vpop.f32.mrb[2].mxu0 }
 0x1db   : > { %v434_v18 = vadd.f32 %v430_v16, %v352_v15  ;;  %v569_v19 = vpop.f32.mrb[3].mxu0 }
 0x1dd   : > { %v441_v20 = vadd.f32 %v439_v17, %v434_v18 }
 0x1df   : > { %443 = vst.msk [vmem:[%s183_s28] sm:$0xff] %vm442_vm3, %v441_v20 }
 0x1e0   : > { %646 = shalt.err (!%p643_p5)
}
 0x1e1   : > { %s647_s10 = scalar_lea.hbm %s827_s5, 128  ;;  %s651_s19 = scalar_lea.hbm %s877_s3, 256 }
 0x1e2   : > { %p648_p6 = scmp.ne.s32.totalorder %s827_s5, %s647_s10  ;;  %p652_p10 = scmp.lt.u32.totalorder %s827_s5, %s877_s3 }
 0x1e3   : > { %p653_p11 = scmp.lt.u32.totalorder %s651_s19, %s647_s10  ;;  %p655_p13 = scmp.lt.u32.totalorder %s647_s10, %s827_s5 }
 0x1e4   : > { %p649_p7 = pnand %p648_p6, %p780_p4 }
 0x1e5   : > { %p654_p12 = por %p653_p11, %p652_p10 }
 0x1e6   : > { %p650_p9 = pneg %p649_p7 }
 0x1e7   : > { %p656_p0 = por %p655_p13, %p654_p12 }
 0x1e9   : > { %p657_p1 = pnand %p656_p0, %p650_p9 }
 0x1eb   : > { %660 = shalt.err (!%p657_p1)
}
 0x1ec   : > { %570 = dma.vmem_to_hbm [thread:$0]  (%p780_p4), %s829_s29, 128, %s827_s5, %s445_s6  }
 0x1ed PF: > { %p576_p2 = scmp.ge.s32.totalorder %s711_s17, 2  ;;  %s471_s26 = sand.u32 1, %s691_s12  }
 0x1ee   : > { %s472_s27 = scalar_lea.sflag [#allocation3], %s471_s26 }
 0x1ef   : > { %p573_p3 = pnand %p576_p2, %p787_p8 }
 0x1f1   : > { %686 = dma.done.wait (!%p573_p3), %s472_s27, 128  }
 0x1f2   : > { %688 = vsyncadd (!%p573_p3), %s472_s27, 4294967168  ;;  %s16_s17 = sadd.s32 1, %s711_s17   ;;  %s880_s12 = smov %s695_s13 }
 0x1f3   : > { %p13_p5 = scmp.ge.s32.totalorder %s16_s17, 4   ;;  %s881_s13 = smov %s699_s14 }
 0x1f4   : > { %s882_s14 = smov %s793_s25  ;;  %s883_s15 = smov %s707_s16 }
 0x1f5   : > { %s884_s16 = smov %s886_s20  ;;  %15 = sbr.rel (!%p13_p5) target bundleno = 4 (0x4), region = 69 }
 0x1fc   :  { %477 = vsyncpa [#allocation3], 1 }
 0x1fd   :  { %479 = vsyncpa [#allocation3 + $0x1], 1 }

</bundles_post_ra>
